<compile_context>
chip_gen: v7x
topology: tpu7x:2x2x1
jax: 0.10.0
libtpu: 0.0.40
codegen_flags: <defaults>
</compile_context>

<pallas_src>
import jax
import jax.numpy as jnp
from jax.experimental import pallas as pl
from jax.experimental.pallas import tpu as pltpu


def _round_up(x: int, m: int) -> int:
    return (x + m - 1) // m * m


# ---------------------------------------------------------------------------
# Fused kernel: prompt add -> (folded) encode -> L2 norm -> text sim -> scale
# ---------------------------------------------------------------------------
def clip_head_kernel(scale_ref, pooled_ref, prompt_ref, wf_ref, text_t_ref, o_ref):
    # scale_ref : (1, 1)            f32 SMEM  logit_scale
    # pooled_ref: (1, tile_b, pd_p) f32       streamed pooled patch features
    # prompt_ref: (1, pd_p)         f32       resident pooled visual prompt
    # wf_ref    : (pd_p, E_p)       f32       resident fused encoder weights
    # text_t_ref: (E_p, K_p)        f32       resident text_features.T
    # o_ref     : (1, tile_b, K_p)  f32
    x = pooled_ref[0] + prompt_ref[...]                       # prompt add (tiny VPU op)
    emb = jnp.dot(x, wf_ref[...],
                  preferred_element_type=jnp.float32)          # [tile_b, E_p]  (MXU)
    ss = jnp.sum(emb * emb, axis=-1, keepdims=True)            # [tile_b, 1]
    emb_n = emb * jax.lax.rsqrt(ss)                            # exact x / ||x|| (EUP)
    sim = jnp.dot(emb_n, text_t_ref[...],
                  preferred_element_type=jnp.float32)          # [tile_b, K_p]
    o_ref[0] = scale_ref[0, 0] * sim


# ---------------------------------------------------------------------------
# Wrapper: CustomCLIP.forward
# ---------------------------------------------------------------------------
def custom_clip_forward(images, prompt_full, w_patch, w_proj, text_features,
                        logit_scale, patch_size, *, tile_b=None):
    B, C, H, W = images.shape
    ph = pw = patch_size
    nh, nw = H // ph, W // pw
    pd = C * ph * pw
    E = w_proj.shape[1]
    K = text_features.shape[0]

    pd_p = _round_up(pd, 128)
    E_p = _round_up(E, 128)
    K_p = _round_up(K, 128)

    def pooled_patch_features(x):
        # Mean over the (nh, nw) patch grid -> one [pd] vector per image.
        # The 6-D reshape of contiguous NCHW is a free view and XLA fuses the
        # reduction, so the only materialized intermediate is [b, pd]
        # (P x smaller than the previously patchified tensor).
        b = x.shape[0]
        x6 = x.astype(jnp.float32).reshape(b, C, nh, ph, nw, pw)
        return jnp.mean(x6, axis=(2, 4)).reshape(b, pd)        # [b, C*ph*pw]

    # Fold the two linear maps (valid only for the linear stand-in encoder).
    w_fused = jnp.dot(w_patch.astype(jnp.float32), w_proj.astype(jnp.float32),
                      precision=jax.lax.Precision.HIGHEST)

    # tile_b: up to 512 pooled rows per grid step; prefer >= 2 grid steps so
    # the batch axis can shard across v7x's two TensorCores, and multiples of 8
    # for sublane-dense stores.
    if tile_b is None:
        divisors = [d for d in range(1, min(B, 512) + 1) if B % d == 0]
        two_step = [d for d in divisors if B // d >= 2]
        cands = two_step if two_step else divisors
        mult8 = [d for d in cands if d % 8 == 0]
        tile_b = max(mult8) if mult8 else max(cands)
    assert B % tile_b == 0
    n_tiles = B // tile_b

    pooled = jnp.pad(pooled_patch_features(images), ((0, 0), (0, pd_p - pd)))
    pooled = pooled.reshape(n_tiles, tile_b, pd_p)             # streamed operand
    prompt_pooled = jnp.pad(pooled_patch_features(prompt_full),
                            ((0, 0), (0, pd_p - pd)))           # [1, pd_p] resident
    w_fused_p = jnp.pad(w_fused, ((0, pd_p - pd), (0, E_p - E)))
    text_t = jnp.pad(text_features.T.astype(jnp.float32),
                     ((0, E_p - E), (0, K_p - K)))               # [E_p, K_p] resident
    scale = jnp.asarray(logit_scale, jnp.float32).reshape(1, 1)  # SMEM scalar

    out = pl.pallas_call(
        clip_head_kernel,
        out_shape=jax.ShapeDtypeStruct((n_tiles, tile_b, K_p), jnp.float32),
        grid=(n_tiles,),
        in_specs=[
            pl.BlockSpec(memory_space=pltpu.MemorySpace.SMEM),       # logit_scale
            pl.BlockSpec((1, tile_b, pd_p), lambda i: (i, 0, 0)),    # streamed rows
            pl.BlockSpec((1, pd_p), lambda i: (0, 0)),               # resident prompt
            pl.BlockSpec((pd_p, E_p), lambda i: (0, 0)),             # resident weights
            pl.BlockSpec((E_p, K_p), lambda i: (0, 0)),              # resident text
        ],
        out_specs=pl.BlockSpec((1, tile_b, K_p), lambda i: (i, 0, 0)),
        compiler_params=pltpu.CompilerParams(
            dimension_semantics=("parallel",),       # shard batch over v7x's 2 TCs
            vmem_limit_bytes=48 * 1024 * 1024,       # < 64 MiB physical on v7x
        ),
    )(scale, pooled, prompt_pooled, w_fused_p, text_t)

    # strip lane padding on the class dim
    return out.reshape(B, K_p)[:, :K]


if __name__ == "__main__":
    key = jax.random.PRNGKey(0)
    k_img, k_prompt, k_wp, k_wproj, k_text = jax.random.split(key, 5)

    # small shapes consistent with the forward pass
    B, C, H, W = 2, 3, 16, 16
    patch_size = 4          # image-encoder patch size
    prompt_size = 4         # fixed_patch visual-prompt size
    D, E, K = 32, 32, 8     # patch-embed dim, embedding dim, num classes

    images = jax.random.normal(k_img, (B, C, H, W), jnp.float32)

    # FixedPatchPrompter parameter: [1, C, prompt_size, prompt_size] at the
    # top-left corner of a zero canvas (deterministic init).
    patch_param = jax.random.normal(k_prompt, (1, C, prompt_size, prompt_size),
                                    jnp.float32)
    prompt_full = jnp.zeros((1, C, H, W), jnp.float32)
    prompt_full = prompt_full.at[:, :, :prompt_size, :prompt_size].set(patch_param)

    # stand-in encoder weights (deterministic init)
    w_patch = 0.02 * jax.random.normal(k_wp, (C * patch_size * patch_size, D),
                                       jnp.float32)
    w_proj = 0.02 * jax.random.normal(k_wproj, (D, E), jnp.float32)

    # precomputed, L2-normalized text features (as in precompute_text_features)
    text = jax.random.normal(k_text, (K, E), jnp.float32)
    text_features = text / jnp.linalg.norm(text, axis=-1, keepdims=True)

    # logit_scale = exp(log(1/0.07)) as in CLIP init, detached constant
    logit_scale = jnp.exp(jnp.log(jnp.float32(1.0 / 0.07)))

    sim = custom_clip_forward(images, prompt_full, w_patch, w_proj,
                              text_features, logit_scale, patch_size)
    jax.block_until_ready(sim)

    # pure-JAX reference of the same stand-in forward (prompt add -> patch embed
    # -> mean pool -> projection -> L2 norm -> scaled cosine similarity).
    def reference(imgs):
        x = imgs + prompt_full
        nh = nw = H // patch_size
        p = x.reshape(B, C, nh, patch_size, nw, patch_size)
        p = p.transpose(0, 2, 4, 1, 3, 5).reshape(B, nh * nw, -1)
        h = jnp.einsum('bpd,de->bpe', p, w_patch,
                       precision=jax.lax.Precision.HIGHEST)
        emb = jnp.dot(jnp.mean(h, axis=1), w_proj,
                      precision=jax.lax.Precision.HIGHEST)
        emb = emb / jnp.linalg.norm(emb, axis=-1, keepdims=True)
        return logit_scale * jnp.dot(emb, text_features.T,
                                     precision=jax.lax.Precision.HIGHEST)

    ref = reference(images)
    assert sim.shape == (B, K) and sim.dtype == jnp.float32
    assert bool(jnp.all(jnp.isfinite(sim)))
    assert bool(jnp.allclose(sim, ref, rtol=2e-2, atol=2e-2)), \
        float(jnp.max(jnp.abs(sim - ref)))
    print("KERNEL_OK")
</pallas_src>

<mosaic_0001>
module attributes {stable_mosaic.version = 11 : i64} {
  func.func @clip_head_kernel(%arg0: i32, %arg1: memref<1x1xf32, #tpu.memory_space<smem>>, %arg2: memref<1x1x128xf32, #tpu.memory_space<vmem>>, %arg3: memref<1x128xf32, #tpu.memory_space<vmem>>, %arg4: memref<128x128xf32, #tpu.memory_space<vmem>>, %arg5: memref<128x128xf32, #tpu.memory_space<vmem>>, %arg6: memref<1x1x128xf32, #tpu.memory_space<vmem>>) attributes {dimension_semantics = [#tpu.dimension_semantics<parallel>], iteration_bounds = array<i64: 2>, scalar_prefetch = 0 : i64, scratch_operands = 0 : i64, tpu.core_type = #tpu.core_type<tc>, window_params = [{transform_indices = @transform_0, window_bounds = array<i64: 1, 1>}, {transform_indices = @transform_1, window_bounds = array<i64: 1, 1, 128>}, {pipeline_mode = #tpu.pipeline_mode<synchronous>, transform_indices = @transform_2, window_bounds = array<i64: 1, 128>}, {pipeline_mode = #tpu.pipeline_mode<synchronous>, transform_indices = @transform_3, window_bounds = array<i64: 128, 128>}, {pipeline_mode = #tpu.pipeline_mode<synchronous>, transform_indices = @transform_4, window_bounds = array<i64: 128, 128>}, {transform_indices = @transform_5, window_bounds = array<i64: 1, 1, 128>}]} {
    %c0 = arith.constant 0 : index
    %c0_0 = arith.constant 0 : index
    %c0_1 = arith.constant 0 : index
    %0 = vector.load %arg2[%c0, %c0_0, %c0_1] : memref<1x1x128xf32, #tpu.memory_space<vmem>>, vector<1x1x128xf32>
    %1 = vector.shape_cast %0 : vector<1x1x128xf32> to vector<1x128xf32>
    %c0_2 = arith.constant 0 : index
    %c0_3 = arith.constant 0 : index
    %2 = vector.load %arg3[%c0_2, %c0_3] : memref<1x128xf32, #tpu.memory_space<vmem>>, vector<1x128xf32>
    %3 = arith.addf %1, %2 : vector<1x128xf32>
    %c0_4 = arith.constant 0 : index
    %c0_5 = arith.constant 0 : index
    %4 = vector.load %arg4[%c0_4, %c0_5] : memref<128x128xf32, #tpu.memory_space<vmem>>, vector<128x128xf32>
    %cst = arith.constant dense<0.000000e+00> : vector<1x128xf32>
    %5 = tpu.matmul %3, %4, %cst {dimension_numbers = #tpu.dot_dimension_numbers<[1], [0], [0], [1], [0, 0, 1, 1], [], []>} : vector<1x128xf32>, vector<128x128xf32>, vector<1x128xf32> -> vector<1x128xf32>
    %6 = arith.mulf %5, %5 : vector<1x128xf32>
    %cst_6 = arith.constant dense<0.000000e+00> : vector<1xf32>
    %7 = vector.multi_reduction <add>, %6, %cst_6 [1] : vector<1x128xf32> to vector<1xf32>
    %8 = vector.shape_cast %7 : vector<1xf32> to vector<1x1xf32>
    %9 = math.rsqrt %8 : vector<1x1xf32>
    %10 = vector.broadcast %9 : vector<1x1xf32> to vector<1x128xf32>
    %11 = arith.mulf %5, %10 : vector<1x128xf32>
    %c0_7 = arith.constant 0 : index
    %c0_8 = arith.constant 0 : index
    %12 = vector.load %arg5[%c0_7, %c0_8] : memref<128x128xf32, #tpu.memory_space<vmem>>, vector<128x128xf32>
    %cst_9 = arith.constant dense<0.000000e+00> : vector<1x128xf32>
    %13 = tpu.matmul %11, %12, %cst_9 {dimension_numbers = #tpu.dot_dimension_numbers<[1], [0], [0], [1], [0, 0, 1, 1], [], []>} : vector<1x128xf32>, vector<128x128xf32>, vector<1x128xf32> -> vector<1x128xf32>
    %c0_10 = arith.constant 0 : index
    %c0_11 = arith.constant 0 : index
    %14 = memref.load %arg1[%c0_10, %c0_11] : memref<1x1xf32, #tpu.memory_space<smem>>
    %15 = vector.broadcast %14 : f32 to vector<1x128xf32>
    %16 = arith.mulf %15, %13 : vector<1x128xf32>
    %c0_12 = arith.constant 0 : index
    %c0_13 = arith.constant 0 : index
    %c0_14 = arith.constant 0 : index
    %17 = vector.load %arg6[%c0_12, %c0_13, %c0_14] : memref<1x1x128xf32, #tpu.memory_space<vmem>>, vector<1x1x128xf32>
    %18 = vector.shape_cast %17 : vector<1x1x128xf32> to vector<1x128xf32>
    %19 = vector.shape_cast %16 : vector<1x128xf32> to vector<1x1x128xf32>
    tpu.vector_store %arg6[%c0_12, %c0_13, %c0_14], %19 {strides = array<i32>} : memref<1x1x128xf32, #tpu.memory_space<vmem>>, vector<1x1x128xf32>,
    return
  }
  func.func @transform_0(%arg0: i32) -> (i32, i32) {
    %c0_i32 = arith.constant 0 : i32
    %c0_i32_0 = arith.constant 0 : i32
    %c0_i32_1 = arith.constant 0 : i32
    return %c0_i32, %c0_i32_0 : i32, i32
  }
  func.func @transform_1(%arg0: i32) -> (i32, i32, i32) {
    %c0_i32 = arith.constant 0 : i32
    %c0_i32_0 = arith.constant 0 : i32
    %c0_i32_1 = arith.constant 0 : i32
    return %arg0, %c0_i32, %c0_i32_0 : i32, i32, i32
  }
  func.func @transform_2(%arg0: i32) -> (i32, i32) {
    %c0_i32 = arith.constant 0 : i32
    %c0_i32_0 = arith.constant 0 : i32
    %c0_i32_1 = arith.constant 0 : i32
    return %c0_i32, %c0_i32_0 : i32, i32
  }
  func.func @transform_3(%arg0: i32) -> (i32, i32) {
    %c0_i32 = arith.constant 0 : i32
    %c0_i32_0 = arith.constant 0 : i32
    %c0_i32_1 = arith.constant 0 : i32
    return %c0_i32, %c0_i32_0 : i32, i32
  }
  func.func @transform_4(%arg0: i32) -> (i32, i32) {
    %c0_i32 = arith.constant 0 : i32
    %c0_i32_0 = arith.constant 0 : i32
    %c0_i32_1 = arith.constant 0 : i32
    return %c0_i32, %c0_i32_0 : i32, i32
  }
  func.func @transform_5(%arg0: i32) -> (i32, i32, i32) {
    %c0_i32 = arith.constant 0 : i32
    %c0_i32_0 = arith.constant 0 : i32
    %c0_i32_1 = arith.constant 0 : i32
    return %arg0, %c0_i32, %c0_i32_0 : i32, i32, i32
  }
}

</mosaic_0001>

<bundles_post_ra>
// kernel: tpu_custom_call.1
= control target key start
LH: loop header
LB: loop body
LE: loop exit
PB: predicated region body
PF: predicated region fallthrough
CT: control target
= control target key end

     0   :  { %s1110_s0 = inlined_call_operand.<no memory space> [shape: f32[1,1], index: 0, kind: input, shape index: {}]   ;;  %s1111_s1 = inlined_call_operand.vmem [shape: f32[2,1,128], index: 1, kind: input, shape index: {}]   ;;  %s1112_s2 = inlined_call_operand.vmem [shape: f32[1,128], index: 2, kind: input, shape index: {}]   ;;  %s1113_s3 = inlined_call_operand.hbm [shape: f32[128,128], index: 3, kind: input, shape index: {}]   ;;  %s1114_s4 = inlined_call_operand.hbm [shape: f32[128,128], index: 4, kind: input, shape index: {}]   ;;  %s1115_s5 = inlined_call_operand.hbm [shape: f32[2,1,128], index: 5, kind: output, shape index: {}]  }
   0x1   :  { %10 = sst [smem:[#allocation2]] %s1110_s0 }
   0x2   :  { %11 = vsyncpa [#allocation4], 0 }
   0x3   :  { %12 = vsyncpa [#allocation7], 0 }
   0x4   :  { %13 = vsyncpa [#allocation5], 0 }
   0x5   :  { %15 = vsyncpa [#allocation5 + $0x1], 0  ;;  %s919_s20 = smov 0   ;;  %s921_s21 = smov 0  }
   0x6   :  { %s923_s22 = smov 0   ;;  %s925_s23 = smov 0  }
   0x7 LB: > { %s940_s0 = sadd.s32 4294967295, %s876_s23   ;;  %s520_s24 = sadd.s32 4294967294, %s876_s23   ;;  %s876_s23 = sphi %s925_s23, %s1133_s23   ;;  %s872_s22 = sphi %s923_s22, %s1132_s22   ;;  %s868_s21 = sphi %s921_s21, %s1131_s21   ;;  %s864_s20 = sphi %s919_s20, %s1130_s20  }
   0x8   : > { %s944_s25 = sadd.s32 1, %s876_s23   ;;  %s138_s26 = sadd.s32 1, %s872_s22 }
   0x9   : > { %s135_s27 = ssub.s32 %s876_s23, %s944_s25  ;;  %p148_p0 = scmp.ne.s32.totalorder %s872_s22, %s868_s21 }
   0xa   : > { %p136_p1 = scmp.eq.s32.totalorder %s135_s27, 0  ;;  %p149_p2 = scmp.eq.s32.totalorder %s940_s0, 1 }
   0xb   : > { %p154_p3 = scmp.ne.s32.totalorder %s868_s21, %s864_s20  ;;  %p155_p4 = scmp.eq.s32.totalorder %s520_s24, 1 }
   0xc   : > { %s955_s28 = scalar_select %p136_p1, %s872_s22, %s138_s26  }
   0xd   : > { %p957_p5 = por %p149_p2, %p148_p0  ;;  %p961_p6 = por %p155_p4, %p154_p3 }
   0xe   : > { %p521_p7 = scmp.ge.s32.totalorder %s876_s23, 1  ;;  %p162_p8 = scmp.lt.s32.totalorder %s876_s23, 3 }
   0xf   : > { %s1119_s29 = scalar_select %p957_p5, 1, 0 }
  0x10   : > { %s1120_s30 = scalar_select %p961_p6, 1, 0 }
  0x11   : > { %p1116_p9 = scmp.eq.s32.totalorder %s940_s0, 0  ;;  %p968_p10 = pnand %p521_p7, %p162_p8 }
  0x12   : > { %s878_s7 = smov [#allocation3]   ;;  %s879_s10 = smov [#allocation6]  }
  0x13   : > { %s1121_s6 = scalar_select %p968_p10, 1, 0 }
  0x14   : > { %s180_s8 = sshll.u32 %s878_s7, 4  ;;  %p693_p11 = pneg %p968_p10  ;;  %s181_s8 = int_to_ptr.vmem [resolvable:$true] %s180_s8 }
  0x15   : > { %s193_s11 = sshll.u32 %s879_s10, 4  ;;  %s750_s14 = scalar_lea.hbm %s1113_s3, 2048  ;;  %s980_s11 = int_to_ptr.vmem [resolvable:$true] %s193_s11 }
  0x16   : > { %p976_p12 = pnand %p1116_p9, %p693_p11  ;;  %p751_p13 = scmp.ne.s32.totalorder %s1113_s3, %s750_s14 }
  0x17   : > { %p757_p3 = scmp.lt.u32.totalorder %s750_s14, %s1113_s3 }
  0x18   : > { %p752_p0 = pneg %p976_p12 }
  0x1a   : > { %p753_p1 = pnand %p752_p0, %p751_p13 }
  0x1c   : > { %p754_p2 = pneg %p753_p1 }
  0x1e   : > { %p759_p4 = pnand %p757_p3, %p754_p2 }
  0x20   : > { %762 = shalt.err (!%p759_p4)
}
  0x21   : > { %s763_s19 = scalar_lea.vmem %s181_s8, 2048  ;;  %p771_p9 = scmp.lt.s32.totalorder %s181_s8, %s181_s8 }
  0x22   : > { %p764_p7 = scmp.ne.s32.totalorder %s181_s8, %s763_s19  ;;  %p772_p6 = scmp.lt.s32.totalorder %s763_s19, %s763_s19 }
  0x24   : > { %p766_p8 = pnand %p764_p7, %p752_p0  ;;  %p773_p5 = por %p772_p6, %p771_p9 }
  0x26   : > { %p767_p11 = pneg %p766_p8 }
  0x28   : > { %p774_p10 = pnand %p773_p5, %p767_p11 }
  0x2a   : > { %777 = shalt.err (!%p774_p10)
}
  0x2b   : > { %s880_s24 = smov 128   ;;  %s881_s26 = smov 8  }
  0x2c   : > { %696 = dma.hbm_to_vmem [thread:$0]  (!%p976_p12), %s1113_s3, 2048, %s181_s8, [#allocation4], %s880_s24, %s880_s24, %s881_s26  }
  0x2d   : > { %s778_s13 = scalar_lea.hbm %s1114_s4, 2048 }
  0x2e   : > { %p779_p13 = scmp.ne.s32.totalorder %s1114_s4, %s778_s13  ;;  %p785_p9 = scmp.lt.u32.totalorder %s778_s13, %s1114_s4 }
  0x30   : > { %p781_p5 = pnand %p779_p13, %p752_p0 }
  0x32   : > { %p782_p6 = pneg %p781_p5 }
  0x34   : > { %p787_p10 = pnand %p785_p9, %p782_p6 }
  0x36   : > { %790 = shalt.err (!%p787_p10)
}
  0x37   : > { %s791_s8 = scalar_lea.vmem %s980_s11, 2048  ;;  %p799_p4 = scmp.lt.s32.totalorder %s980_s11, %s980_s11 }
  0x38   : > { %p792_p1 = scmp.ne.s32.totalorder %s980_s11, %s791_s8  ;;  %p800_p7 = scmp.lt.s32.totalorder %s791_s8, %s791_s8 }
  0x3a   : > { %p794_p2 = pnand %p792_p1, %p752_p0  ;;  %p801_p8 = por %p800_p7, %p799_p4 }
  0x3c   : > { %p795_p3 = pneg %p794_p2 }
  0x3e   : > { %p802_p11 = pnand %p801_p8, %p795_p3 }
  0x40   : > { %805 = shalt.err (!%p802_p11)
}
  0x41   : > { %699 = dma.hbm_to_vmem [thread:$0]  (!%p976_p12), %s1114_s4, 2048, %s980_s11, [#allocation7], %s880_s24, %s880_s24, %s881_s26  }
  0x42   : > { %p1123_p13 = scmp.ne.s32.totalorder %s1121_s6, 0 }
  0x43   : > { %p1124_p5 = scmp.eq.s32.totalorder (!%p1123_p13), %s940_s0, 0 }
  0x44   : > { %215 = sbr.rel (%p1123_p13) target bundleno = 713 (0x2c9), region = 40 }
  0x4b   : > { %851 = dma.done.wait (%p1124_p5), [#allocation4], 2048   ;;  %p1125_p0 = pmov %p1124_p5 }
  0x4d   : > { %853 = vsyncadd (%p1125_p0), [#allocation4], 4294965248  ;;  %p1126_p6 = pmov %p1125_p0 }
  0x4e   : > { %p1127_p9 = pmov %p1125_p0 }
  0x4f   : > { %855 = dma.done.wait (%p1126_p6), [#allocation7], 2048  }
  0x50   : > { %857 = vsyncadd (%p1127_p9), [#allocation7], 4294965248  ;;  %v882_v0 = vmov 0.0|0.0   ;;  %vm883_vm0 = vmmov 0   ;;  %v884_v1 = vmov 0.0   ;;  %v250_v2 = vld [vmem:[#allocation3] sm:$0xff] }
  0x51   : > { %635 = vmatprep.subr.bf16.mxu0 %v882_v0  ;;  %597 = vmatprep.mubr.msk.f32.mxu0 %vm883_vm0, %v884_v1  ;;  %v251_v3 = vld [vmem:[#allocation3 + $0x8] sm:$0xff]  ;;  %v252_v4 = vld [vmem:[#allocation3 + $0x10] sm:$0xff]  ;;  %v253_v6 = vld [vmem:[#allocation3 + $0x18] sm:$0xff]  ;;  %p244_p12 = scmp.lt.s32.totalorder %s940_s0, 1  ;;  %vm337_vm1 = vcmask 1040384   ;;  %s429_s7 = sld [smem:[#allocation2]] }
  0x52   : > { %659 = vmatprep.subr.bf16.mxu1 %v882_v0  ;;  %632 = vmatprep.mubr.msk.f32.mxu1 %vm883_vm0, %v884_v1  ;;  %v636_v5 = vpack.c.bf16 %v251_v3, %v250_v2  ;;  %v639_v7 = vpack.c.bf16 %v253_v6, %v252_v4  ;;  %v254_v8 = vld [vmem:[#allocation3 + $0x20] sm:$0xff]  ;;  %v255_v9 = vld [vmem:[#allocation3 + $0x28] sm:$0xff]  ;;  %v256_v11 = vld [vmem:[#allocation3 + $0x30] sm:$0xff]  ;;  %s242_s10 = sand.u32 1, %s868_s21   ;;  %s528_s12 = sshll.u32 %s940_s0, 4 }
  0x53   : > { %v642_v10 = vpack.c.bf16 %v255_v9, %v254_v8  ;;  %v257_v12 = vld [vmem:[#allocation3 + $0x38] sm:$0xff]  ;;  %v258_v14 = vld [vmem:[#allocation3 + $0x40] sm:$0xff]  ;;  %v259_v15 = vld [vmem:[#allocation3 + $0x48] sm:$0xff]  ;;  %s245_s6 = scalar_select %p244_p12, %s940_s0, 1 }
  0x54   : > { %637 = vmatpush3.bf16.msra.mxu0 %v636_v5  ;;  %v645_v13 = vpack.c.bf16 %v257_v12, %v256_v11  ;;  %v648_v16 = vpack.c.bf16 %v259_v15, %v258_v14  ;;  %v260_v17 = vld [vmem:[#allocation3 + $0x50] sm:$0xff]  ;;  %v261_v18 = vld [vmem:[#allocation3 + $0x58] sm:$0xff]  ;;  %v262_v20 = vld [vmem:[#allocation3 + $0x60] sm:$0xff]  ;;  %s243_s13 = scalar_lea.vmem [#allocation8], %s242_s10  ;;  %s1068_s17 = scalar_lea.hbm %s1115_s5, %s528_s12 }
  0x55   : > { %638 = vmatprep.subr.bf16.mxu0 %v882_v0  ;;  %v651_v19 = vpack.c.bf16 %v261_v18, %v260_v17  ;;  %v263_v21 = vld [vmem:[#allocation3 + $0x68] sm:$0xff]  ;;  %v264_v23 = vld [vmem:[#allocation3 + $0x70] sm:$0xff]  ;;  %v265_v24 = vld [vmem:[#allocation3 + $0x78] sm:$0xff]  ;;  %s246_s24 = scalar_lea.vmem %s1111_s1, %s245_s6  ;;  %s446_s14 = sshll.u32 %s243_s13, 4  ;;  %s1070_s14 = int_to_ptr.vmem [resolvable:$true] %s446_s14 }
  0x56   : > { %v654_v22 = vpack.c.bf16 %v263_v21, %v262_v20  ;;  %v657_v25 = vpack.c.bf16 %v265_v24, %v264_v23  ;;  %v247_v26 = vld [vmem:[%s246_s24] sm:$0x1]  ;;  %v344_v30 = vld [vmem:[#allocation6 + $0x8] sm:$0xff]  ;;  %v345_v31 = vld [vmem:[#allocation6 + $0x10] sm:$0xff]  ;;  %s434_s8 = scalar_lea.sflag [#allocation5], %s242_s10  ;;  %s806_s18 = scalar_lea.vmem %s1070_s14, 16 }
  0x57   : > { %v248_v27 = vld [vmem:[%s1112_s2] sm:$0x1]  ;;  %v346_v33 = vld [vmem:[#allocation6 + $0x18] sm:$0xff]  ;;  %v348_v36 = vld [vmem:[#allocation6 + $0x28] sm:$0xff]  ;;  %v430_v60 = vstv %s429_s7  ;;  %p807_p10 = scmp.ne.s32.totalorder %s1070_s14, %s806_s18  ;;  %p1128_p1 = scmp.ne.s32.totalorder %s1119_s29, 0 }
  0x58   : > { %640 = vmatpush3.bf16.msra.mxu0 %v639_v7  ;;  %v249_v28 = vadd.f32 %v248_v27, %v247_v26  ;;  %v343_v29 = vld [vmem:[#allocation6] sm:$0xff]  ;;  %v663_v34 = vpack.c.bf16 %v346_v33, %v345_v31  ;;  %v349_v38 = vld [vmem:[#allocation6 + $0x30] sm:$0xff]  ;;  %v350_v39 = vld [vmem:[#allocation6 + $0x38] sm:$0xff]  ;;  %s885_s0 = smov [#allocation8]  }
  0x59   : > { %641 = vmatprep.subr.bf16.mxu0 %v882_v0  ;;  %v660_v32 = vpack.c.bf16 %v344_v30, %v343_v29  ;;  %v347_v35 = vld [vmem:[#allocation6 + $0x20] sm:$0xff]  ;;  %v669_v40 = vpack.c.bf16 %v350_v39, %v349_v38  ;;  %v352_v42 = vld [vmem:[#allocation6 + $0x48] sm:$0xff]  ;;  %v353_v48 = vld [vmem:[#allocation6 + $0x50] sm:$0xff]  ;;  %p808_p2 = pnand %p807_p10, %p1128_p1  ;;  %s810_s19 = sshll.u32 %s885_s0, 4  ;;  %s811_s19 = int_to_ptr.vmem [resolvable:$false] %s810_s19 }
  0x5a   : > { %v666_v37 = vpack.c.bf16 %v348_v36, %v347_v35  ;;  %v351_v41 = vld [vmem:[#allocation6 + $0x40] sm:$0xff]  ;;  %v354_v49 = vld [vmem:[#allocation6 + $0x58] sm:$0xff]  ;;  %v356_v52 = vld [vmem:[#allocation6 + $0x68] sm:$0xff]  ;;  %s812_s6 = scalar_lea.vmem %s811_s19, 32  ;;  %p813_p4 = scmp.lt.s32.totalorder %s1070_s14, %s811_s19 }
  0x5b   : > { %661 = vmatpush3.bf16.msra.mxu1 %v660_v32  ;;  %v672_v43 = vpack.c.bf16 %v352_v42, %v351_v41  ;;  %v675_v50 = vpack.c.bf16 %v354_v49, %v353_v48  ;;  %v355_v51 = vld [vmem:[#allocation6 + $0x60] sm:$0xff]  ;;  %v357_v54 = vld [vmem:[#allocation6 + $0x70] sm:$0xff]  ;;  %v358_v55 = vld [vmem:[#allocation6 + $0x78] sm:$0xff]  ;;  %p809_p3 = pneg %p808_p2  ;;  %p814_p7 = scmp.lt.s32.totalorder %s812_s6, %s806_s18 }
  0x5c   : > { %643 = vmatpush3.bf16.msra.mxu0 %v642_v10  ;;  %662 = vmatprep.subr.bf16.mxu1 %v882_v0  ;;  %v678_v53 = vpack.c.bf16 %v356_v52, %v355_v51  ;;  %v681_v56 = vpack.c.bf16 %v358_v55, %v357_v54 }
  0x5d   : > { %644 = vmatprep.subr.bf16.mxu0 %v882_v0  ;;  %p815_p8 = por %p814_p7, %p813_p4 }
  0x5f   : > { %664 = vmatpush3.bf16.msra.mxu1 %v663_v34  ;;  %p816_p11 = pnand %p815_p8, %p809_p3 }
  0x60   : > { %646 = vmatpush3.bf16.msra.mxu0 %v645_v13  ;;  %665 = vmatprep.subr.bf16.mxu1 %v882_v0 }
  0x61   : > { %647 = vmatprep.subr.bf16.mxu0 %v882_v0 }
  0x63   : > { %667 = vmatpush3.bf16.msra.mxu1 %v666_v37 }
  0x64   : > { %649 = vmatpush3.bf16.msra.mxu0 %v648_v16  ;;  %668 = vmatprep.subr.bf16.mxu1 %v882_v0 }
  0x65   : > { %650 = vmatprep.subr.bf16.mxu0 %v882_v0 }
  0x67   : > { %670 = vmatpush3.bf16.msra.mxu1 %v669_v40 }
  0x68   : > { %652 = vmatpush3.bf16.msra.mxu0 %v651_v19  ;;  %671 = vmatprep.subr.bf16.mxu1 %v882_v0 }
  0x69   : > { %653 = vmatprep.subr.bf16.mxu0 %v882_v0 }
  0x6b   : > { %673 = vmatpush3.bf16.msra.mxu1 %v672_v43 }
  0x6c   : > { %655 = vmatpush3.bf16.msra.mxu0 %v654_v22  ;;  %674 = vmatprep.subr.bf16.mxu1 %v882_v0 }
  0x6d   : > { %656 = vmatprep.subr.bf16.mxu0 %v882_v0 }
  0x6f   : > { %676 = vmatpush3.bf16.msra.mxu1 %v675_v50 }
  0x70   : > { %658 = vmatpush3.bf16.msra.mxu0 %v657_v25  ;;  %677 = vmatprep.subr.bf16.mxu1 %v882_v0 }
  0x73   : > { %598 = vmatmul.mubr.f32.vlgmr.msra.gmra.mrb[0].mxu0 %v249_v28  ;;  %679 = vmatpush3.bf16.msra.mxu1 %v678_v53 }
  0x74   : > { %680 = vmatprep.subr.bf16.mxu1 %v882_v0 }
  0x77   : > { %682 = vmatpush3.bf16.msra.mxu1 %v681_v56 }
 0x146   : > { %v332_v44 = vpop.f32.mrb[0].mxu0 }
 0x147   : > { %v599_v45 = vpop.f32.mrb[1].mxu0  ;;  %v336_v46 = vmul.f32 %v332_v44, %v332_v44 }
 0x149   : > { %v338_v47 = vsel %vm337_vm1, %v336_v46, 0.0 }
 0x14a   : > { %339 = vadd.xlane.f32.xlu0 %v338_v47 }
 0x1d7   : > { %v340_v57 = vpop.xlane.xlu0 %339 }
 0x1d8   : > { %748 = vrsqrt.f32 %v340_v57 }
 0x1e2   : > { %v749_v58 = vpop.eup %748 }
 0x1e3   : > { %v342_v59 = vmul.f32 %v749_v58, %v332_v44 }
 0x1e5   : > { %633 = vmatmul.mubr.f32.vlgmr.msra.gmra.mrb[0].mxu1 %v342_v59 }
 0x2b8   : > { %v425_v61 = vpop.f32.mrb[0].mxu1 }
 0x2b9   : > { %v431_v62 = vmul.f32 %v430_v60, %v425_v61  ;;  %v634_v63 = vpop.f32.mrb[1].mxu1 }
 0x2bb   : > { %432 = vst [vmem:[%s243_s13] sm:$0x1] %v431_v62 }
 0x2bc   : > { %819 = shalt.err (!%p816_p11)
}
 0x2bd   : > { %s820_s9 = scalar_lea.hbm %s1068_s17, 16  ;;  %s824_s26 = scalar_lea.hbm %s1115_s5, 32 }
 0x2be   : > { %p821_p13 = scmp.ne.s32.totalorder %s1068_s17, %s820_s9  ;;  %p825_p6 = scmp.lt.u32.totalorder %s1068_s17, %s1115_s5 }
 0x2bf   : > { %p826_p9 = scmp.lt.u32.totalorder %s824_s26, %s820_s9  ;;  %p828_p10 = scmp.lt.u32.totalorder %s820_s9, %s1068_s17 }
 0x2c0   : > { %p822_p5 = pnand %p821_p13, %p1128_p1 }
 0x2c1   : > { %p827_p12 = por %p826_p9, %p825_p6 }
 0x2c2   : > { %p823_p0 = pneg %p822_p5 }
 0x2c3   : > { %p829_p2 = por %p828_p10, %p827_p12 }
 0x2c5   : > { %p830_p3 = pnand %p829_p2, %p823_p0 }
 0x2c7   : > { %833 = shalt.err (!%p830_p3)
}
 0x2c8   : > { %691 = dma.vmem_to_hbm [thread:$0]  (%p1128_p1), %s1070_s14, 16, %s1068_s17, %s434_s8  }
 0x2c9 PF: > { %p708_p4 = scmp.ge.s32.totalorder %s876_s23, 2  ;;  %s458_s10 = sand.u32 1, %s864_s20  }
 0x2ca   : > { %p1129_p7 = scmp.ne.s32.totalorder %s1120_s30, 0  ;;  %s459_s12 = scalar_lea.sflag [#allocation5], %s458_s10 }
 0x2cc   : > { %p701_p8 = pnand %p708_p4, %p1129_p7 }
 0x2ce   : > { %859 = dma.done.wait (!%p701_p8), %s459_s12, 16  }
 0x2cf   : > { %861 = vsyncadd (!%p701_p8), %s459_s12, 4294967280  ;;  %p18_p11 = scmp.ge.s32.totalorder %s944_s25, 4   ;;  %s1130_s20 = smov %s868_s21 }
 0x2d0   : > { %s1131_s21 = smov %s872_s22  ;;  %s1132_s22 = smov %s955_s28 }
 0x2d1   : > { %s1133_s23 = smov %s944_s25  ;;  %20 = sbr.rel (!%p18_p11) target bundleno = 7 (0x7), region = 84 }
 0x2d8   :  { %463 = vsyncpa [#allocation4], 1 }
 0x2d9   :  { %465 = vsyncpa [#allocation4 + $0x1], 1 }
 0x2da   :  { %466 = vsyncpa [#allocation7], 1 }
 0x2db   :  { %467 = vsyncpa [#allocation5], 1 }
 0x2dc   :  { %469 = vsyncpa [#allocation5 + $0x1], 1 }

</bundles_post_ra>
